<compile_context>
chip_gen: v5e
topology: v5e:2x2
jax: 0.10.0
libtpu: 0.0.40
codegen_flags: <defaults>
</compile_context>

<pallas_src>
import functools

import jax
import jax.numpy as jnp
from jax.experimental import pallas as pl
from jax.experimental.pallas import tpu as pltpu


def _gelu_exact(x):
    # ACT2FN["gelu"] in HF transformers == exact (erf-based) GELU.
    return 0.5 * x * (1.0 + jax.lax.erf(x * (1.0 / jnp.sqrt(2.0).astype(x.dtype))))


def _round_up(a, b):
    return ((a + b - 1) // b) * b


def ffn_kernel(x_ref, w1_ref, b1_ref, w2_ref, b2_ref, gamma_ref, beta_ref,
               o_ref, acc_ref, *, eps):
    k = pl.program_id(1)

    @pl.when(k == 0)
    def _init():
        acc_ref[...] = jnp.zeros_like(acc_ref)

    # fc1 chunk: MXU matmul in native dtype, f32 accumulation; bias + GELU epilogue in f32.
    h = jnp.dot(x_ref[...], w1_ref[...], preferred_element_type=jnp.float32)
    h = _gelu_exact(h + b1_ref[...].astype(jnp.float32))            # (tm, tk_i) f32

    # fc2 chunk, accumulated over the intermediate dim into f32 scratch.
    acc_ref[...] += jnp.dot(h.astype(w2_ref.dtype), w2_ref[...],
                            preferred_element_type=jnp.float32)

    @pl.when(k == pl.num_programs(1) - 1)
    def _finalize():
        # TODO(synk): nn.Dropout is identity in eval mode; training-mode dropout omitted.
        y = acc_ref[...] + b2_ref[...].astype(jnp.float32)
        z = y + x_ref[...].astype(jnp.float32)                      # residual
        mean = jnp.mean(z, axis=-1, keepdims=True)
        centered = z - mean
        var = jnp.mean(centered * centered, axis=-1, keepdims=True)
        zn = centered * jax.lax.rsqrt(var + eps)
        out = zn * gamma_ref[...].astype(jnp.float32) + beta_ref[...].astype(jnp.float32)
        o_ref[...] = out.astype(o_ref.dtype)


def _spec(shape, index_map, mode=None):
    """BlockSpec helper; falls back gracefully if pipeline_mode is unsupported."""
    if mode is None:
        return pl.BlockSpec(shape, index_map)
    try:
        return pl.BlockSpec(shape, index_map, pipeline_mode=mode)
    except TypeError:
        return pl.BlockSpec(shape, index_map)


def feed_forward(x, w1, b1, w2, b2, gamma, beta, *, eps=1e-12,
                 tm=256, tk_i=512, vmem_limit_bytes=64 * 1024 * 1024):
    """x: [B, S, H] -> [B, S, H]  (fc1 -> GELU -> fc2 -> +residual -> LayerNorm)"""
    B, S, H = x.shape
    I = w1.shape[1]
    T = B * S

    # Token-tile the flattened (B*S) axis; clamp the tile for tiny inputs and pad
    # instead of requiring divisibility. (tm multiple of 8 keeps f32 sublane tiling.)
    tm = max(8, min(tm, _round_up(T, 8)))
    n_i = pl.cdiv(T, tm)
    T_pad = n_i * tm
    x2 = x.reshape(T, H)
    if T_pad != T:
        x2 = jnp.pad(x2, ((0, T_pad - T), (0, 0)))

    # Intermediate-dim chunking (streams W1/W2, bounds the (tm, I) live intermediate).
    if tk_i >= I or I % tk_i != 0 or tk_i % 128 != 0:
        tk_i = I
    n_k = I // tk_i

    # keep params 2-D for clean TPU (sublane, lane) layouts
    b1_2 = b1.reshape(1, I)
    b2_2 = b2.reshape(1, H)
    g_2 = gamma.reshape(1, H)
    be_2 = beta.reshape(1, H)

    const_buf = pl.Buffered(1)                       # fetched once -> no double buffering
    w_buf = pl.Buffered(1) if n_k == 1 else None     # streamed -> default double buffering

    itemsize = jnp.dtype(x.dtype).itemsize
    cost = pl.CostEstimate(
        flops=4 * T_pad * H * I,                     # two matmuls
        transcendentals=T_pad * I,                   # erf in GELU
        bytes_accessed=int(2 * T_pad * H * itemsize
                           + w1.size * jnp.dtype(w1.dtype).itemsize
                           + w2.size * jnp.dtype(w2.dtype).itemsize
                           + 4 * (I + 3 * H)))

    out2 = pl.pallas_call(
        functools.partial(ffn_kernel, eps=eps),
        out_shape=jax.ShapeDtypeStruct((T_pad, H), x.dtype),
        grid_spec=pltpu.PrefetchScalarGridSpec(
            num_scalar_prefetch=0,
            grid=(n_i, n_k),
            in_specs=[
                _spec((tm, H), lambda i, k: (i, 0)),               # x tile (resident over k)
                _spec((H, tk_i), lambda i, k: (0, k), w_buf),      # W1 chunk
                _spec((1, tk_i), lambda i, k: (0, k), w_buf),      # b1 chunk
                _spec((tk_i, H), lambda i, k: (k, 0), w_buf),      # W2 chunk
                _spec((1, H), lambda i, k: (0, 0), const_buf),     # b2
                _spec((1, H), lambda i, k: (0, 0), const_buf),     # LN gamma
                _spec((1, H), lambda i, k: (0, 0), const_buf),     # LN beta
            ],
            out_specs=pl.BlockSpec((tm, H), lambda i, k: (i, 0)),
            scratch_shapes=[pltpu.VMEM((tm, H), jnp.float32)],     # fc2 accumulator
        ),
        compiler_params=pltpu.CompilerParams(
            dimension_semantics=("parallel", "arbitrary"),
            vmem_limit_bytes=vmem_limit_bytes),
        cost_estimate=cost,
    )(x2, w1, b1_2, w2, b2_2, g_2, be_2)

    return out2[:T].reshape(B, S, H)


if __name__ == "__main__":
    # small config: batch=2, seq=8, hidden=128, intermediate=256
    B, S, H, I = 2, 8, 128, 256
    eps = 1e-12

    key = jax.random.PRNGKey(0)
    k_x, k_w1, k_b1, k_w2, k_b2 = jax.random.split(key, 5)

    x = jax.random.normal(k_x, (B, S, H), dtype=jnp.float32)
    # deterministic synthetic parameters (nn.Linear-shaped, stored transposed as [in, out])
    w1 = 0.02 * jax.random.normal(k_w1, (H, I), dtype=jnp.float32)
    b1 = 0.01 * jax.random.normal(k_b1, (I,), dtype=jnp.float32)
    w2 = 0.02 * jax.random.normal(k_w2, (I, H), dtype=jnp.float32)
    b2 = 0.01 * jax.random.normal(k_b2, (H,), dtype=jnp.float32)
    gamma = jnp.ones((H,), dtype=jnp.float32)   # nn.LayerNorm default init
    beta = jnp.zeros((H,), dtype=jnp.float32)

    out = feed_forward(x, w1, b1, w2, b2, gamma, beta, eps=eps)
    out = jax.block_until_ready(out)

    # pure-JAX reference check
    x2 = x.reshape(-1, H)
    h = _gelu_exact(x2 @ w1 + b1)
    y = h @ w2 + b2
    z = y + x2
    mu = jnp.mean(z, axis=-1, keepdims=True)
    var = jnp.mean((z - mu) ** 2, axis=-1, keepdims=True)
    ref = ((z - mu) * jax.lax.rsqrt(var + eps) * gamma + beta).reshape(B, S, H)
    assert jnp.allclose(out, ref, atol=1e-4, rtol=1e-4), "mismatch vs reference"

    print("KERNEL_OK")
</pallas_src>

<mosaic_0001>
module attributes {stable_mosaic.version = 11 : i64} {
  func.func @ffn_kernel(%arg0: i32, %arg1: i32, %arg2: memref<16x128xf32, #tpu.memory_space<vmem>>, %arg3: memref<128x256xf32, #tpu.memory_space<vmem>>, %arg4: memref<1x256xf32, #tpu.memory_space<vmem>>, %arg5: memref<256x128xf32, #tpu.memory_space<vmem>>, %arg6: memref<1x128xf32, #tpu.memory_space<vmem>>, %arg7: memref<1x128xf32, #tpu.memory_space<vmem>>, %arg8: memref<1x128xf32, #tpu.memory_space<vmem>>, %arg9: memref<16x128xf32, #tpu.memory_space<vmem>>, %arg10: memref<16x128xf32, #tpu.memory_space<vmem>>) attributes {dimension_semantics = [#tpu.dimension_semantics<parallel>, #tpu.dimension_semantics<arbitrary>], iteration_bounds = array<i64: 1, 1>, scalar_prefetch = 0 : i64, scratch_operands = 1 : i64, tpu.core_type = #tpu.core_type<tc>, window_params = [{transform_indices = @transform_0, window_bounds = array<i64: 16, 128>}, {pipeline_mode = #tpu.pipeline_mode<synchronous>, transform_indices = @transform_1, window_bounds = array<i64: 128, 256>}, {pipeline_mode = #tpu.pipeline_mode<synchronous>, transform_indices = @transform_2, window_bounds = array<i64: 1, 256>}, {pipeline_mode = #tpu.pipeline_mode<synchronous>, transform_indices = @transform_3, window_bounds = array<i64: 256, 128>}, {pipeline_mode = #tpu.pipeline_mode<synchronous>, transform_indices = @transform_4, window_bounds = array<i64: 1, 128>}, {pipeline_mode = #tpu.pipeline_mode<synchronous>, transform_indices = @transform_5, window_bounds = array<i64: 1, 128>}, {pipeline_mode = #tpu.pipeline_mode<synchronous>, transform_indices = @transform_6, window_bounds = array<i64: 1, 128>}, {transform_indices = @transform_7, window_bounds = array<i64: 16, 128>}]} {
    %c0_i32 = arith.constant 0 : i32
    %0 = arith.cmpi eq, %arg1, %c0_i32 : i32
    %1 = arith.extui %0 : i1 to i32
    %c0_i32_0 = arith.constant 0 : i32
    %2 = arith.cmpi ne, %1, %c0_i32_0 : i32
    scf.if %2 {
      %cst_19 = arith.constant 0.000000e+00 : f32
      %27 = vector.broadcast %cst_19 : f32 to vector<16x128xf32>
      %c0_20 = arith.constant 0 : index
      %c0_21 = arith.constant 0 : index
      %28 = vector.load %arg10[%c0_20, %c0_21] : memref<16x128xf32, #tpu.memory_space<vmem>>, vector<16x128xf32>
      tpu.vector_store %arg10[%c0_20, %c0_21], %27 {strides = array<i32>} : memref<16x128xf32, #tpu.memory_space<vmem>>, vector<16x128xf32>,
    } else {
    }
    %c0 = arith.constant 0 : index
    %c0_1 = arith.constant 0 : index
    %3 = vector.load %arg2[%c0, %c0_1] : memref<16x128xf32, #tpu.memory_space<vmem>>, vector<16x128xf32>
    %c0_2 = arith.constant 0 : index
    %c0_3 = arith.constant 0 : index
    %4 = vector.load %arg3[%c0_2, %c0_3] : memref<128x256xf32, #tpu.memory_space<vmem>>, vector<128x256xf32>
    %cst = arith.constant dense<0.000000e+00> : vector<16x256xf32>
    %5 = tpu.matmul %3, %4, %cst {dimension_numbers = #tpu.dot_dimension_numbers<[1], [0], [0], [1], [0, 0, 1, 1], [], []>} : vector<16x128xf32>, vector<128x256xf32>, vector<16x256xf32> -> vector<16x256xf32>
    %c0_4 = arith.constant 0 : index
    %c0_5 = arith.constant 0 : index
    %6 = vector.load %arg4[%c0_4, %c0_5] : memref<1x256xf32, #tpu.memory_space<vmem>>, vector<1x256xf32>
    %7 = vector.broadcast %6 : vector<1x256xf32> to vector<16x256xf32>
    %8 = arith.addf %5, %7 : vector<16x256xf32>
    %cst_6 = arith.constant 5.000000e-01 : f32
    %9 = vector.broadcast %cst_6 : f32 to vector<16x256xf32>
    %10 = arith.mulf %9, %8 : vector<16x256xf32>
    %cst_7 = arith.constant 2.000000e+00 : f32
    %11 = math.sqrt %cst_7 : f32
    %cst_8 = arith.constant 1.000000e+00 : f32
    %12 = arith.divf %cst_8, %11 : f32
    %13 = vector.broadcast %12 : f32 to vector<16x256xf32>
    %14 = arith.mulf %8, %13 : vector<16x256xf32>
    %15 = math.erf %14 : vector<16x256xf32>
    %cst_9 = arith.constant 1.000000e+00 : f32
    %16 = vector.broadcast %cst_9 : f32 to vector<16x256xf32>
    %17 = arith.addf %16, %15 : vector<16x256xf32>
    %18 = arith.mulf %10, %17 : vector<16x256xf32>
    %c0_10 = arith.constant 0 : index
    %c0_11 = arith.constant 0 : index
    %19 = vector.load %arg10[%c0_10, %c0_11] : memref<16x128xf32, #tpu.memory_space<vmem>>, vector<16x128xf32>
    %c0_12 = arith.constant 0 : index
    %c0_13 = arith.constant 0 : index
    %20 = vector.load %arg5[%c0_12, %c0_13] : memref<256x128xf32, #tpu.memory_space<vmem>>, vector<256x128xf32>
    %cst_14 = arith.constant dense<0.000000e+00> : vector<16x128xf32>
    %21 = tpu.matmul %18, %20, %cst_14 {dimension_numbers = #tpu.dot_dimension_numbers<[1], [0], [0], [1], [0, 0, 1, 1], [], []>} : vector<16x256xf32>, vector<256x128xf32>, vector<16x128xf32> -> vector<16x128xf32>
    %22 = arith.addf %19, %21 : vector<16x128xf32>
    %c0_15 = arith.constant 0 : index
    %c0_16 = arith.constant 0 : index
    %23 = vector.load %arg10[%c0_15, %c0_16] : memref<16x128xf32, #tpu.memory_space<vmem>>, vector<16x128xf32>
    tpu.vector_store %arg10[%c0_15, %c0_16], %22 {strides = array<i32>} : memref<16x128xf32, #tpu.memory_space<vmem>>, vector<16x128xf32>,
    %c0_i32_17 = arith.constant 0 : i32
    %24 = arith.cmpi eq, %arg1, %c0_i32_17 : i32
    %25 = arith.extui %24 : i1 to i32
    %c0_i32_18 = arith.constant 0 : i32
    %26 = arith.cmpi ne, %25, %c0_i32_18 : i32
    scf.if %26 {
      %c0_19 = arith.constant 0 : index
      %c0_20 = arith.constant 0 : index
      %27 = vector.load %arg10[%c0_19, %c0_20] : memref<16x128xf32, #tpu.memory_space<vmem>>, vector<16x128xf32>
      %c0_21 = arith.constant 0 : index
      %c0_22 = arith.constant 0 : index
      %28 = vector.load %arg6[%c0_21, %c0_22] : memref<1x128xf32, #tpu.memory_space<vmem>>, vector<1x128xf32>
      %29 = vector.broadcast %28 : vector<1x128xf32> to vector<16x128xf32>
      %30 = arith.addf %27, %29 : vector<16x128xf32>
      %c0_23 = arith.constant 0 : index
      %c0_24 = arith.constant 0 : index
      %31 = vector.load %arg2[%c0_23, %c0_24] : memref<16x128xf32, #tpu.memory_space<vmem>>, vector<16x128xf32>
      %32 = arith.addf %30, %31 : vector<16x128xf32>
      %cst_25 = arith.constant dense<0.000000e+00> : vector<16xf32>
      %33 = vector.multi_reduction <add>, %32, %cst_25 [1] : vector<16x128xf32> to vector<16xf32>
      %34 = vector.shape_cast %33 : vector<16xf32> to vector<16x1xf32>
      %cst_26 = arith.constant 1.280000e+02 : f32
      %35 = vector.broadcast %cst_26 : f32 to vector<16x1xf32>
      %36 = arith.divf %34, %35 : vector<16x1xf32>
      %37 = vector.broadcast %36 : vector<16x1xf32> to vector<16x128xf32>
      %38 = arith.subf %32, %37 : vector<16x128xf32>
      %39 = arith.mulf %38, %38 : vector<16x128xf32>
      %cst_27 = arith.constant dense<0.000000e+00> : vector<16xf32>
      %40 = vector.multi_reduction <add>, %39, %cst_27 [1] : vector<16x128xf32> to vector<16xf32>
      %41 = vector.shape_cast %40 : vector<16xf32> to vector<16x1xf32>
      %cst_28 = arith.constant 1.280000e+02 : f32
      %42 = vector.broadcast %cst_28 : f32 to vector<16x1xf32>
      %43 = arith.divf %41, %42 : vector<16x1xf32>
      %cst_29 = arith.constant 9.99999996E-13 : f32
      %44 = vector.broadcast %cst_29 : f32 to vector<16x1xf32>
      %45 = arith.addf %43, %44 : vector<16x1xf32>
      %46 = math.rsqrt %45 : vector<16x1xf32>
      %47 = vector.broadcast %46 : vector<16x1xf32> to vector<16x128xf32>
      %48 = arith.mulf %38, %47 : vector<16x128xf32>
      %c0_30 = arith.constant 0 : index
      %c0_31 = arith.constant 0 : index
      %49 = vector.load %arg7[%c0_30, %c0_31] : memref<1x128xf32, #tpu.memory_space<vmem>>, vector<1x128xf32>
      %50 = vector.broadcast %49 : vector<1x128xf32> to vector<16x128xf32>
      %51 = arith.mulf %48, %50 : vector<16x128xf32>
      %c0_32 = arith.constant 0 : index
      %c0_33 = arith.constant 0 : index
      %52 = vector.load %arg8[%c0_32, %c0_33] : memref<1x128xf32, #tpu.memory_space<vmem>>, vector<1x128xf32>
      %53 = vector.broadcast %52 : vector<1x128xf32> to vector<16x128xf32>
      %54 = arith.addf %51, %53 : vector<16x128xf32>
      %c0_34 = arith.constant 0 : index
      %c0_35 = arith.constant 0 : index
      %55 = vector.load %arg9[%c0_34, %c0_35] : memref<16x128xf32, #tpu.memory_space<vmem>>, vector<16x128xf32>
      tpu.vector_store %arg9[%c0_34, %c0_35], %54 {strides = array<i32>} : memref<16x128xf32, #tpu.memory_space<vmem>>, vector<16x128xf32>,
    } else {
    }
    return
  }
  func.func @transform_0(%arg0: i32, %arg1: i32) -> (i32, i32) {
    %c0_i32 = arith.constant 0 : i32
    %c0_i32_0 = arith.constant 0 : i32
    return %arg0, %c0_i32 : i32, i32
  }
  func.func @transform_1(%arg0: i32, %arg1: i32) -> (i32, i32) {
    %c0_i32 = arith.constant 0 : i32
    %c0_i32_0 = arith.constant 0 : i32
    return %c0_i32, %arg1 : i32, i32
  }
  func.func @transform_2(%arg0: i32, %arg1: i32) -> (i32, i32) {
    %c0_i32 = arith.constant 0 : i32
    %c0_i32_0 = arith.constant 0 : i32
    return %c0_i32, %arg1 : i32, i32
  }
  func.func @transform_3(%arg0: i32, %arg1: i32) -> (i32, i32) {
    %c0_i32 = arith.constant 0 : i32
    %c0_i32_0 = arith.constant 0 : i32
    return %arg1, %c0_i32 : i32, i32
  }
  func.func @transform_4(%arg0: i32, %arg1: i32) -> (i32, i32) {
    %c0_i32 = arith.constant 0 : i32
    %c0_i32_0 = arith.constant 0 : i32
    %c0_i32_1 = arith.constant 0 : i32
    return %c0_i32, %c0_i32_0 : i32, i32
  }
  func.func @transform_5(%arg0: i32, %arg1: i32) -> (i32, i32) {
    %c0_i32 = arith.constant 0 : i32
    %c0_i32_0 = arith.constant 0 : i32
    %c0_i32_1 = arith.constant 0 : i32
    return %c0_i32, %c0_i32_0 : i32, i32
  }
  func.func @transform_6(%arg0: i32, %arg1: i32) -> (i32, i32) {
    %c0_i32 = arith.constant 0 : i32
    %c0_i32_0 = arith.constant 0 : i32
    %c0_i32_1 = arith.constant 0 : i32
    return %c0_i32, %c0_i32_0 : i32, i32
  }
  func.func @transform_7(%arg0: i32, %arg1: i32) -> (i32, i32) {
    %c0_i32 = arith.constant 0 : i32
    %c0_i32_0 = arith.constant 0 : i32
    return %arg0, %c0_i32 : i32, i32
  }
}

</mosaic_0001>

<bundles_post_ra>
// kernel: tpu_custom_call.1
= control target key start
LH: loop header
LB: loop body
LE: loop exit
PB: predicated region body
PF: predicated region fallthrough
CT: control target
= control target key end

     0   :  { %12 = vsyncpa [#allocation4], 0  ;;  %s887_s0 = inlined_call_operand.hbm [shape: f32[16,128], index: 0, kind: input, shape index: {}]   ;;  %s888_s1 = inlined_call_operand.hbm [shape: f32[128,256], index: 1, kind: input, shape index: {}]   ;;  %s889_s2 = inlined_call_operand.hbm [shape: f32[1,256], index: 2, kind: input, shape index: {}]   ;;  %s890_s3 = inlined_call_operand.hbm [shape: f32[256,128], index: 3, kind: input, shape index: {}]   ;;  %s891_s4 = inlined_call_operand.vmem [shape: f32[1,128], index: 4, kind: input, shape index: {}]   ;;  %s892_s5 = inlined_call_operand.vmem [shape: f32[1,128], index: 5, kind: input, shape index: {}]   ;;  %s893_s6 = inlined_call_operand.vmem [shape: f32[1,128], index: 6, kind: input, shape index: {}]   ;;  %s894_s7 = inlined_call_operand.hbm [shape: f32[16,128], index: 7, kind: output, shape index: {}]  }
   0x1   :  { %13 = vsyncpa [#allocation7], 0 }
   0x2   :  { %14 = vsyncpa [#allocation10], 0  ;;  %s33_s26 = sshll.u32 %s888_s1, 4  ;;  %s34_s26 = int_to_ptr.hbm [resolvable:$true] %s33_s26 }
   0x3   :  { %15 = vsyncpa [#allocation5], 0  ;;  %s696_s27 = smov [#allocation6]   ;;  %s20_s8 = sshll.u32 %s887_s0, 4  ;;  %s21_s8 = int_to_ptr.hbm [resolvable:$true] %s20_s8 }
   0x4   :  { %s35_s28 = sshll.u32 %s696_s27, 4  ;;  %s697_s9 = smov 256   ;;  %s36_s28 = int_to_ptr.vmem [resolvable:$true] %s35_s28 }
   0x5   :  { %s698_s10 = smov 16   ;;  %s699_s11 = smov [#allocation3]  }
   0x6   :  { %41 = dma.hbm_to_vmem [thread:$0]  %s34_s26, 4096, %s36_s28, [#allocation7], %s697_s9, %s697_s9, %s698_s10  }
   0x7   :  { %s22_s12 = sshll.u32 %s699_s11, 4  ;;  %s700_s13 = smov 128   ;;  %s23_s12 = int_to_ptr.vmem [resolvable:$true] %s22_s12 }
   0x8   :  { %s701_s14 = smov 8   ;;  %s47_s16 = sshll.u32 %s889_s2, 4  ;;  %s48_s16 = int_to_ptr.hbm [resolvable:$true] %s47_s16 }
   0x9   :  { %28 = dma.hbm_to_vmem [thread:$0]  %s21_s8, 256, %s23_s12, [#allocation4], %s700_s13, %s700_s13, %s701_s14  }
   0xa   :  { %s702_s17 = smov [#allocation8]   ;;  %s57_s20 = sshll.u32 %s890_s3, 4  ;;  %s58_s20 = int_to_ptr.hbm [resolvable:$true] %s57_s20 }
   0xb   :  { %s49_s0 = sshll.u32 %s702_s17, 4  ;;  %s703_s21 = smov [#allocation9]   ;;  %s50_s0 = int_to_ptr.vmem [resolvable:$true] %s49_s0 }
   0xc   :  { %52 = dma.hbm_to_vmem [thread:$0]  %s48_s16, 32, %s50_s0, [#allocation7]  }
   0xd   :  { %s59_s22 = sshll.u32 %s703_s21, 4  ;;  %s60_s22 = int_to_ptr.vmem [resolvable:$true] %s59_s22 }
   0xe   :  { %65 = dma.hbm_to_vmem [thread:$0]  %s58_s20, 4096, %s60_s22, [#allocation10], %s700_s13, %s700_s13, %s701_s14  }
   0xf   :  { %688 = dma.done.wait [#allocation4], 256  }
  0x10   :  { %689 = vsyncadd [#allocation4], 4294967040 }
  0x11   :  { %690 = dma.done.wait [#allocation7], 4128  }
  0x12   :  { %691 = vsyncadd [#allocation7], 4294963168 }
  0x13   :  { %692 = dma.done.wait [#allocation10], 4096  }
  0x14   :  { %693 = vsyncadd [#allocation10], 4294963200  ;;  %v126_v0 = vld [vmem:[#allocation6 + $0xf0] sm:$0xff]  ;;  %v127_v1 = vld [vmem:[#allocation6 + $0xf8] sm:$0xff]  ;;  %s522_s29 = sshll.u32 %s894_s7, 4  ;;  %s523_s29 = int_to_ptr.hbm [resolvable:$true] %s522_s29 }
  0x15   :  { %v124_v2 = vld [vmem:[#allocation6 + $0xe0] sm:$0xff]  ;;  %134 = vmatpush.msra.mxu0 %v126_v0  ;;  %157 = vmatpush.msra.mxu1 %v127_v1  ;;  %v125_v3 = vld [vmem:[#allocation6 + $0xe8] sm:$0xff]  ;;  %v122_v4 = vld [vmem:[#allocation6 + $0xd0] sm:$0xff] }
  0x16   :  { %v123_v5 = vld [vmem:[#allocation6 + $0xd8] sm:$0xff]  ;;  %v120_v6 = vld [vmem:[#allocation6 + $0xc0] sm:$0xff]  ;;  %v121_v7 = vld [vmem:[#allocation6 + $0xc8] sm:$0xff] }
  0x17   :  { %135 = vmatpush.msra.mxu0 %v124_v2  ;;  %158 = vmatpush.msra.mxu1 %v125_v3  ;;  %v118_v8 = vld [vmem:[#allocation6 + $0xb0] sm:$0xff]  ;;  %v119_v9 = vld [vmem:[#allocation6 + $0xb8] sm:$0xff]  ;;  %v116_v10 = vld [vmem:[#allocation6 + $0xa0] sm:$0xff] }
  0x18   :  { %v117_v11 = vld [vmem:[#allocation6 + $0xa8] sm:$0xff]  ;;  %v114_v12 = vld [vmem:[#allocation6 + $0x90] sm:$0xff]  ;;  %v115_v13 = vld [vmem:[#allocation6 + $0x98] sm:$0xff] }
  0x19   :  { %136 = vmatpush.msra.mxu0 %v122_v4  ;;  %159 = vmatpush.msra.mxu1 %v123_v5  ;;  %v112_v14 = vld [vmem:[#allocation6 + $0x80] sm:$0xff]  ;;  %v113_v15 = vld [vmem:[#allocation6 + $0x88] sm:$0xff]  ;;  %v110_v16 = vld [vmem:[#allocation6 + $0x70] sm:$0xff] }
  0x1a   :  { %v111_v17 = vld [vmem:[#allocation6 + $0x78] sm:$0xff]  ;;  %v108_v18 = vld [vmem:[#allocation6 + $0x60] sm:$0xff]  ;;  %v109_v19 = vld [vmem:[#allocation6 + $0x68] sm:$0xff] }
  0x1b   :  { %137 = vmatpush.msra.mxu0 %v120_v6  ;;  %160 = vmatpush.msra.mxu1 %v121_v7  ;;  %v106_v20 = vld [vmem:[#allocation6 + $0x50] sm:$0xff]  ;;  %v107_v21 = vld [vmem:[#allocation6 + $0x58] sm:$0xff]  ;;  %v104_v22 = vld [vmem:[#allocation6 + $0x40] sm:$0xff] }
  0x1c   :  { %v105_v23 = vld [vmem:[#allocation6 + $0x48] sm:$0xff]  ;;  %v102_v24 = vld [vmem:[#allocation6 + $0x30] sm:$0xff]  ;;  %v103_v25 = vld [vmem:[#allocation6 + $0x38] sm:$0xff] }
  0x1d   :  { %138 = vmatpush.msra.mxu0 %v118_v8  ;;  %161 = vmatpush.msra.mxu1 %v119_v9  ;;  %v100_v26 = vld [vmem:[#allocation6 + $0x20] sm:$0xff]  ;;  %v101_v27 = vld [vmem:[#allocation6 + $0x28] sm:$0xff]  ;;  %v98_v28 = vld [vmem:[#allocation6 + $0x10] sm:$0xff] }
  0x1e   :  { %v99_v29 = vld [vmem:[#allocation6 + $0x18] sm:$0xff]  ;;  %v96_v30 = vld [vmem:[#allocation6] sm:$0xff]  ;;  %v97_v31 = vld [vmem:[#allocation6 + $0x8] sm:$0xff] }
  0x1f   :  { %139 = vmatpush.msra.mxu0 %v116_v10  ;;  %162 = vmatpush.msra.mxu1 %v117_v11  ;;  %v764_v32 = vld [vmem:[#allocation3] sm:$0xff]  ;;  %v768_v33 = vld [vmem:[#allocation3 + $0x8] sm:$0xff]  ;;  %v128_v38 = vld [vmem:[#allocation8] sm:$0x3] }
  0x20   :  { %v373_v34 = vld [vmem:[#allocation9 + $0x78] sm:$0xff]  ;;  %v372_v36 = vld [vmem:[#allocation9 + $0x70] sm:$0xff]  ;;  %v371_v39 = vld [vmem:[#allocation9 + $0x68] sm:$0xff]  ;;  %v130_v41 = vperm.slane %v128_v38, 0  ;;  %v131_v42 = vperm.slane %v128_v38, 1 }
  0x21   :  { %140 = vmatpush.msra.mxu0 %v114_v12  ;;  %163 = vmatpush.msra.mxu1 %v115_v13  ;;  %v389_v35 = vld [vmem:[#allocation9 + $0xf8] sm:$0xff]  ;;  %v388_v37 = vld [vmem:[#allocation9 + $0xf0] sm:$0xff]  ;;  %v387_v40 = vld [vmem:[#allocation9 + $0xe8] sm:$0xff] }
  0x22   :  { %390 = vmatpush.msra.mxu2 %v373_v34  ;;  %413 = vmatpush.msra.mxu3 %v389_v35  ;;  %v370_v43 = vld [vmem:[#allocation9 + $0x60] sm:$0xff]  ;;  %v369_v45 = vld [vmem:[#allocation9 + $0x58] sm:$0xff]  ;;  %v368_v51 = vld [vmem:[#allocation9 + $0x50] sm:$0xff] }
  0x23   :  { %141 = vmatpush.msra.mxu0 %v112_v14  ;;  %164 = vmatpush.msra.mxu1 %v113_v15  ;;  %v386_v44 = vld [vmem:[#allocation9 + $0xe0] sm:$0xff]  ;;  %v385_v46 = vld [vmem:[#allocation9 + $0xd8] sm:$0xff]  ;;  %v384_v52 = vld [vmem:[#allocation9 + $0xd0] sm:$0xff] }
  0x24   :  { %391 = vmatpush.msra.mxu2 %v372_v36  ;;  %414 = vmatpush.msra.mxu3 %v388_v37  ;;  %v367_v55 = vld [vmem:[#allocation9 + $0x48] sm:$0xff]  ;;  %v366_v59 = vld [vmem:[#allocation9 + $0x40] sm:$0xff]  ;;  %v365_v61 = vld [vmem:[#allocation9 + $0x38] sm:$0xff] }
  0x25   :  { %142 = vmatpush.msra.mxu0 %v110_v16  ;;  %165 = vmatpush.msra.mxu1 %v111_v17  ;;  %v383_v56 = vld [vmem:[#allocation9 + $0xc8] sm:$0xff]  ;;  %v382_v60 = vld [vmem:[#allocation9 + $0xc0] sm:$0xff]  ;;  %v381_v62 = vld [vmem:[#allocation9 + $0xb8] sm:$0xff] }
  0x26   :  { %392 = vmatpush.msra.mxu2 %v371_v39  ;;  %415 = vmatpush.msra.mxu3 %v387_v40  ;;  %v364_v3 = vld [vmem:[#allocation9 + $0x30] sm:$0xff]  ;;  %v363_v9 = vld [vmem:[#allocation9 + $0x28] sm:$0xff]  ;;  %v362_v16 = vld [vmem:[#allocation9 + $0x20] sm:$0xff] }
  0x27   :  { %143 = vmatpush.msra.mxu0 %v108_v18  ;;  %166 = vmatpush.msra.mxu1 %v109_v19  ;;  %v380_v4 = vld [vmem:[#allocation9 + $0xb0] sm:$0xff]  ;;  %v379_v10 = vld [vmem:[#allocation9 + $0xa8] sm:$0xff]  ;;  %v378_v17 = vld [vmem:[#allocation9 + $0xa0] sm:$0xff] }
  0x28   :  { %393 = vmatpush.msra.mxu2 %v370_v43  ;;  %416 = vmatpush.msra.mxu3 %v386_v44  ;;  %v360_v34 = vld [vmem:[#allocation9 + $0x10] sm:$0xff]  ;;  %v359_v40 = vld [vmem:[#allocation9 + $0x8] sm:$0xff] }
  0x29   :  { %144 = vmatpush.msra.mxu0 %v106_v20  ;;  %167 = vmatpush.msra.mxu1 %v107_v21  ;;  %v376_v35 = vld [vmem:[#allocation9 + $0x90] sm:$0xff] }
  0x2a   :  { %394 = vmatpush.msra.mxu2 %v369_v45  ;;  %417 = vmatpush.msra.mxu3 %v385_v46 }
  0x2b   :  { %145 = vmatpush.msra.mxu0 %v104_v22  ;;  %168 = vmatpush.msra.mxu1 %v105_v23 }
  0x2c   :  { %395 = vmatpush.msra.mxu2 %v368_v51  ;;  %418 = vmatpush.msra.mxu3 %v384_v52  ;;  %v374_v51 = vld [vmem:[#allocation9 + $0x80] sm:$0xff] }
  0x2d   :  { %146 = vmatpush.msra.mxu0 %v102_v24  ;;  %169 = vmatpush.msra.mxu1 %v103_v25  ;;  %v361_v24 = vld [vmem:[#allocation9 + $0x18] sm:$0xff] }
  0x2e   :  { %396 = vmatpush.msra.mxu2 %v367_v55  ;;  %419 = vmatpush.msra.mxu3 %v383_v56  ;;  %v377_v25 = vld [vmem:[#allocation9 + $0x98] sm:$0xff] }
  0x2f   :  { %147 = vmatpush.msra.mxu0 %v100_v26  ;;  %170 = vmatpush.msra.mxu1 %v101_v27 }
  0x30   :  { %397 = vmatpush.msra.mxu2 %v366_v59  ;;  %420 = vmatpush.msra.mxu3 %v382_v60 }
  0x31   :  { %148 = vmatpush.msra.mxu0 %v98_v28  ;;  %171 = vmatpush.msra.mxu1 %v99_v29 }
  0x32   :  { %398 = vmatpush.msra.mxu2 %v365_v61  ;;  %421 = vmatpush.msra.mxu3 %v381_v62 }
  0x33   :  { %149 = vmatpush.msra.mxu0 %v96_v30  ;;  %172 = vmatpush.msra.mxu1 %v97_v31 }
  0x34   :  { %150 = vmatmul.f32.vlgmr.msra.gmra.mxu0 %v764_v32  ;;  %173 = vmatmul.f32.vlgmr.msra.gmra.mxu1 %v764_v32 }
  0x35   :  { %399 = vmatpush.msra.mxu2 %v364_v3  ;;  %422 = vmatpush.msra.mxu3 %v380_v4 }
  0x37   :  { %400 = vmatpush.msra.mxu2 %v363_v9  ;;  %423 = vmatpush.msra.mxu3 %v379_v10 }
  0x39   :  { %401 = vmatpush.msra.mxu2 %v362_v16  ;;  %424 = vmatpush.msra.mxu3 %v378_v17 }
  0x3b   :  { %402 = vmatpush.msra.mxu2 %v361_v24  ;;  %425 = vmatpush.msra.mxu3 %v377_v25 }
  0x3c   :  { %153 = vmatmul.f32.gmra.mxu0 %v768_v33  ;;  %176 = vmatmul.f32.gmra.mxu1 %v768_v33 }
  0x3d   :  { %403 = vmatpush.msra.mxu2 %v360_v34  ;;  %426 = vmatpush.msra.mxu3 %v376_v35 }
  0x3f   :  { %404 = vmatpush.msra.mxu2 %v359_v40 }
  0xb1   :  { %v151_v47 = vpop.f32.mrf.mxu0  ;;  %v174_v48 = vpop.f32.mrf.mxu1 }
  0xb2   :  { %v772_v49 = vadd.f32 %v151_v47, %v130_v41  ;;  %v774_v50 = vadd.f32 %v174_v48, %v131_v42  ;;  %v358_v48 = vld [vmem:[#allocation9] sm:$0xff] }
  0xb3   :  { %405 = vmatpush.msra.mxu2 %v358_v48 }
  0xb4   :  { %v777_v53 = vmul.f32 0.70710677, %v772_v49  ;;  %v780_v54 = vmul.f32 0.70710677, %v774_v50 }
  0xb6   :  { %v188_v57 = vmul.f32 %v777_v53, %v777_v53  ;;  %v228_v58 = vmul.f32 %v780_v54, %v780_v54 }
  0xb8   :  { %v786_v63 = vmin.f32 %v188_v57, 16.0  ;;  %v788_v0 = vmin.f32 %v228_v58, 16.0 }
  0xb9   :  { %v154_v1 = vpop.f32.mrf.mxu0  ;;  %v177_v2 = vpop.f32.mrf.mxu1 }
  0xba   :  { %v190_v5 = vmul.f32 2.1237322e-06, %v786_v63  ;;  %v230_v6 = vmul.f32 2.1237322e-06, %v788_v0  ;;  %v792_v7 = vadd.f32 %v154_v1, %v130_v41  ;;  %v794_v8 = vadd.f32 %v177_v2, %v131_v42  ;;  %v375_v41 = vld [vmem:[#allocation9 + $0x88] sm:$0xff] }
  0xbb   :  { %v201_v11 = vmul.f32 3.8918573e-05, %v786_v63  ;;  %v241_v21 = vmul.f32 3.8918573e-05, %v788_v0  ;;  %427 = vmatpush.msra.mxu3 %v375_v41 }
  0xbc   :  { %v191_v12 = vadd.f32 0.00028619796, %v190_v5  ;;  %v231_v13 = vadd.f32 0.00028619796, %v230_v6  ;;  %v798_v14 = vmul.f32 0.70710677, %v792_v7 }
  0xbd   :  { %v801_v15 = vmul.f32 0.70710677, %v794_v8  ;;  %v202_v20 = vadd.f32 0.001143296, %v201_v11  ;;  %v242_v29 = vadd.f32 0.001143296, %v241_v21  ;;  %428 = vmatpush.msra.mxu3 %v374_v51 }
  0xbe   :  { %v192_v18 = vmul.f32 %v191_v12, %v786_v63  ;;  %v232_v19 = vmul.f32 %v231_v13, %v788_v0  ;;  %v268_v22 = vmul.f32 %v798_v14, %v798_v14 }
  0xbf   :  { %v308_v23 = vmul.f32 %v801_v15, %v801_v15  ;;  %v203_v28 = vmul.f32 %v202_v20, %v786_v63  ;;  %v243_v38 = vmul.f32 %v242_v29, %v788_v0 }
  0xc0   :  { %v193_v26 = vadd.f32 0.0036580483, %v192_v18  ;;  %v233_v27 = vadd.f32 0.0036580483, %v232_v19  ;;  %v811_v30 = vmin.f32 %v268_v22, 16.0 }
  0xc1   :  { %v813_v31 = vmin.f32 %v308_v23, 16.0  ;;  %v204_v37 = vadd.f32 0.014752088, %v203_v28  ;;  %v244_v46 = vadd.f32 0.014752088, %v243_v38 }
  0xc2   :  { %v194_v36 = vmul.f32 %v193_v26, %v786_v63  ;;  %v270_v39 = vmul.f32 2.1237322e-06, %v811_v30  ;;  %v281_v42 = vmul.f32 3.8918573e-05, %v811_v30  ;;  %v234_v43 = vmul.f32 %v233_v27, %v788_v0 }
  0xc3   :  { %v310_v44 = vmul.f32 2.1237322e-06, %v813_v31  ;;  %v205_v45 = vmul.f32 %v204_v37, %v786_v63  ;;  %v245_v57 = vmul.f32 %v244_v46, %v788_v0  ;;  %v321_v60 = vmul.f32 3.8918573e-05, %v813_v31 }
  0xc4   :  { %v271_v47 = vadd.f32 0.00028619796, %v270_v39  ;;  %v282_v52 = vadd.f32 0.001143296, %v281_v42  ;;  %v195_v55 = vadd.f32 0.05243302, %v194_v36 }
  0xc5   :  { %v206_v56 = vadd.f32 0.112945676, %v205_v45  ;;  %v235_v61 = vadd.f32 0.05243302, %v234_v43  ;;  %v311_v62 = vadd.f32 0.00028619796, %v310_v44 }
  0xc6   :  { %v272_v58 = vmul.f32 %v271_v47, %v811_v30  ;;  %v283_v59 = vmul.f32 %v282_v52, %v811_v30  ;;  %v246_v2 = vadd.f32 0.112945676, %v245_v57  ;;  %v196_v5 = vmul.f32 %v195_v55, %v786_v63 }
  0xc7   :  { %v207_v1 = vmul.f32 %v206_v56, %v786_v63  ;;  %v322_v11 = vadd.f32 0.001143296, %v321_v60  ;;  %v236_v12 = vmul.f32 %v235_v61, %v788_v0  ;;  %v312_v13 = vmul.f32 %v311_v62, %v813_v31 }
  0xc8   :  { %v273_v3 = vadd.f32 0.0036580483, %v272_v58  ;;  %v284_v4 = vadd.f32 0.014752088, %v283_v59  ;;  %v247_v9 = vmul.f32 %v246_v2, %v788_v0  ;;  %v197_v21 = vadd.f32 0.18741608, %v196_v5 }
  0xc9   :  { %v208_v6 = vadd.f32 0.4994258, %v207_v1  ;;  %v323_v20 = vmul.f32 %v322_v11, %v813_v31  ;;  %v237_v26 = vadd.f32 0.18741608, %v236_v12  ;;  %v313_v27 = vadd.f32 0.0036580483, %v312_v13 }
  0xca   :  { %v285_v10 = vmul.f32 %v284_v4, %v811_v30  ;;  %v248_v17 = vadd.f32 0.4994258, %v247_v9  ;;  %v274_v18 = vmul.f32 %v273_v3, %v811_v30  ;;  %v198_v35 = vmul.f32 %v197_v21, %v786_v63 }
  0xcb   :  { %v209_v16 = vmul.f32 %v208_v6, %v786_v63  ;;  %v324_v25 = vadd.f32 0.014752088, %v323_v20  ;;  %v238_v37 = vmul.f32 %v237_v26, %v788_v0  ;;  %v314_v38 = vmul.f32 %v313_v27, %v813_v31 }
  0xcc   :  { %v286_v19 = vadd.f32 0.112945676, %v285_v10  ;;  %v249_v23 = vmul.f32 %v248_v17, %v788_v0  ;;  %v275_v28 = vadd.f32 0.05243302, %v274_v18  ;;  %v199_v43 = vadd.f32 1.1283791, %v198_v35 }
  0xcd   :  { %v210_v22 = vadd.f32 1.0, %v209_v16  ;;  %v325_v34 = vmul.f32 %v324_v25, %v813_v31  ;;  %v239_v47 = vadd.f32 1.1283791, %v238_v37  ;;  %v315_v63 = vadd.f32 0.05243302, %v314_v38 }
  0xce   :  { %v287_v24 = vmul.f32 %v286_v19, %v811_v30  ;;  %v250_v29 = vadd.f32 1.0, %v249_v23  ;;  %v276_v41 = vmul.f32 %v275_v28, %v811_v30  ;;  %v200_v55 = vmul.f32 %v199_v43, %v777_v53 }
  0xcf   :  { %554 = vrcp.f32 %v210_v22  ;;  %v326_v40 = vadd.f32 0.112945676, %v325_v34  ;;  %v222_v56 = vand.u32 2147483648, %v210_v22  ;;  %v220_v59 = vand.u32 2147483647, %v210_v22 }
  0xd0   :  { %v288_v36 = vadd.f32 0.4994258, %v287_v24  ;;  %556 = vrcp.f32 %v250_v29  ;;  %v277_v0 = vadd.f32 0.18741608, %v276_v41  ;;  %v240_v61 = vmul.f32 %v239_v47, %v780_v54 }
  0xd1   :  { %v327_v45 = vmul.f32 %v326_v40, %v813_v31  ;;  %v316_v62 = vmul.f32 %v315_v63, %v813_v31  ;;  %vm216_vm1 = vweird.f32 %v210_v22  ;;  %v262_v4 = vand.u32 2147483648, %v250_v29 }
  0xd2   :  { %v289_v39 = vmul.f32 %v288_v36, %v811_v30  ;;  %v278_v2 = vmul.f32 %v277_v0, %v811_v30  ;;  %v223_v6 = vor.u32 1.1754944e-38, %v222_v56  ;;  %v260_v10 = vand.u32 2147483647, %v250_v29 }
  0xd3   :  { %v328_v52 = vadd.f32 0.4994258, %v327_v45  ;;  %vm221_vm4 = vcmp.eq.f32.partialorder %v220_v59, 8.507059e+37  ;;  %v317_v12 = vadd.f32 0.18741608, %v316_v62  ;;  %vm256_vm5 = vweird.f32 %v250_v29 }
  0xd4   :  { %v843_v44 = vadd.f32 1.0, %v289_v39  ;;  %v279_v30 = vadd.f32 1.1283791, %v278_v2  ;;  %v263_v18 = vor.u32 1.1754944e-38, %v262_v4  ;;  %vm261_vm7 = vcmp.eq.f32.partialorder %v260_v10, 8.507059e+37 }
  0xd5   :  { %v555_v42 = vpop.eup %554  ;;  %v329_v60 = vmul.f32 %v328_v52, %v813_v31  ;;  %v180_v26 = vmul.f32 0.5, %v772_v49  ;;  %v181_v49 = vmul.f32 0.5, %v774_v50  ;;  %v182_v50 = vmul.f32 0.5, %v792_v7  ;;  %v551_v7 = vld [vmem:[%s891_s4] ss:$0 sm:$0xff] }
  0xd6   :  { %v212_v46 = vmul.f32 %v555_v42, %v210_v22  ;;  %558 = vrcp.f32 %v843_v44  ;;  %v557_v48 = vpop.eup %556  ;;  %vm217_vm0 = vweird.f32 %v555_v42  ;;  %v300_v21 = vand.u32 2147483647, %v843_v44 }
  0xd7   :  { %v252_v57 = vmul.f32 %v557_v48, %v250_v29  ;;  %v852_v5 = vadd.f32 1.0, %v329_v60  ;;  %vm218_vm2 = vmor %vm216_vm1, %vm217_vm0  ;;  %vm257_vm3 = vweird.f32 %v557_v48  ;;  %v302_v22 = vand.u32 2147483648, %v843_v44 }
  0xd8   :  { %v213_v51 = vsub.f32 1.0, %v212_v46  ;;  %vm258_vm6 = vmor %vm256_vm5, %vm257_vm3  ;;  %v318_v29 = vmul.f32 %v317_v12, %v813_v31  ;;  %vm296_vm9 = vweird.f32 %v843_v44  ;;  %v280_v39 = vmul.f32 %v279_v30, %v798_v14 }
  0xd9   :  { %v253_v1 = vsub.f32 1.0, %v252_v57  ;;  %560 = vrcp.f32 %v852_v5  ;;  %v303_v37 = vor.u32 1.1754944e-38, %v302_v22  ;;  %vm301_vm11 = vcmp.eq.f32.partialorder %v300_v21, 8.507059e+37 }
  0xda   :  { %v214_v58 = vmul.f32 %v555_v42, %v213_v51  ;;  %v319_v31 = vadd.f32 1.1283791, %v318_v29  ;;  %vm336_vm13 = vweird.f32 %v852_v5 }
  0xdb   :  { %v254_v9 = vmul.f32 %v557_v48, %v253_v1 }
  0xdc   :  { %v215_v3 = vadd.f32 %v555_v42, %v214_v58  ;;  %v559_v53 = vpop.eup %558 }
  0xdd   :  { %v292_v54 = vmul.f32 %v559_v53, %v843_v44  ;;  %v255_v16 = vadd.f32 %v557_v48, %v254_v9  ;;  %vm297_vm8 = vweird.f32 %v559_v53  ;;  %v342_v44 = vand.u32 2147483648, %v852_v5 }
  0xde   :  { %v219_v11 = vsel %vm218_vm2, %v555_v42, %v215_v3  ;;  %vm298_vm10 = vmor %vm296_vm9, %vm297_vm8 }
  0xdf   :  { %v224_v13 = vsel %vm221_vm4, %v223_v6, %v219_v11  ;;  %v293_v19 = vsub.f32 1.0, %v292_v54  ;;  %v259_v20 = vsel %vm258_vm6, %v557_v48, %v255_v16  ;;  %v561_v28 = vpop.eup %560  ;;  %v340_v48 = vand.u32 2147483647, %v852_v5 }
  0xe0   :  { %v225_v17 = vmul.f32 %v224_v13, %v200_v55  ;;  %v264_v24 = vsel %vm261_vm7, %v263_v18, %v259_v20  ;;  %v332_v38 = vmul.f32 %v561_v28, %v852_v5  ;;  %vm337_vm12 = vweird.f32 %v561_v28 }
  0xe1   :  { %v294_v25 = vmul.f32 %v559_v53, %v293_v19  ;;  %v265_v27 = vmul.f32 %v264_v24, %v240_v61  ;;  %vm338_vm14 = vmor %vm336_vm13, %vm337_vm12  ;;  %v343_v52 = vor.u32 1.1754944e-38, %v342_v44  ;;  %v320_v55 = vmul.f32 %v319_v31, %v801_v15 }
  0xe2   :  { %v537_v23 = vclamps-f32 %v225_v17, 1.0  ;;  %v333_v45 = vsub.f32 1.0, %v332_v38  ;;  %vm341_vm15 = vcmp.eq.f32.partialorder %v340_v48, 8.507059e+37  ;;  %v183_v61 = vmul.f32 0.5, %v794_v8 }
  0xe3   :  { %v295_v35 = vadd.f32 %v559_v53, %v294_v25  ;;  %v538_v36 = vclamps-f32 %v265_v27, 1.0  ;;  %v704_v11 = vmov 128.0  }
  0xe4   :  { %v348_v34 = vadd.f32 1.0, %v537_v23  ;;  %v334_v63 = vmul.f32 %v561_v28, %v333_v45  ;;  %562 = vrcp.f32 %v704_v11 }
  0xe5   :  { %v299_v41 = vsel %vm298_vm10, %v559_v53, %v295_v35  ;;  %v349_v42 = vadd.f32 1.0, %v538_v36 }
  0xe6   :  { %v352_v40 = vmul.f32 %v348_v34, %v180_v26  ;;  %v304_v43 = vsel %vm301_vm11, %v303_v37, %v299_v41  ;;  %v335_v14 = vadd.f32 %v561_v28, %v334_v63 }
  0xe7   :  { %v305_v46 = vmul.f32 %v304_v43, %v280_v39  ;;  %v353_v47 = vmul.f32 %v349_v42, %v181_v49  ;;  %v553_v43 = vld [vmem:[%s893_s6] ss:$0 sm:$0xff] }
  0xe8   :  { %406 = vmatmul.f32.vlgmr.msra.gmra.mxu2 %v352_v40  ;;  %v339_v56 = vsel %vm338_vm14, %v561_v28, %v335_v14  ;;  %v552_v40 = vld [vmem:[%s892_s5] ss:$0 sm:$0xff]  ;;  %s705_s5 = smov [#allocation11]  }
  0xe9   :  { %v539_v0 = vclamps-f32 %v305_v46, 1.0  ;;  %429 = vmatmul.f32.vlgmr.msra.gmra.mxu3 %v353_v47  ;;  %v344_v58 = vsel %vm341_vm15, %v343_v52, %v339_v56  ;;  %s520_s26 = sshll.u32 %s705_s5, 4  ;;  %s521_s26 = int_to_ptr.vmem [resolvable:$true] %s520_s26 }
  0xea   :  { %v345_v59 = vmul.f32 %v344_v58, %v320_v55  ;;  %v563_v54 = vpop.eup %562 }
  0xeb   :  { %v350_v51 = vadd.f32 1.0, %v539_v0  ;;  %v460_v12 = vmul.f32 128.0, %v563_v54  ;;  %vm464_vm0 = vweird.f32 %v563_v54 }
  0xec   :  { %v540_v60 = vclamps-f32 %v345_v59, 1.0 }
  0xed   :  { %v354_v57 = vmul.f32 %v350_v51, %v182_v50  ;;  %v461_v13 = vsub.f32 1.0, %v460_v12 }
  0xee   :  { %v351_v62 = vadd.f32 1.0, %v540_v60 }
  0xef   :  { %v462_v16 = vmul.f32 %v563_v54, %v461_v13 }
  0xf0   :  { %409 = vmatmul.f32.gmra.mxu2 %v354_v57  ;;  %v355_v1 = vmul.f32 %v351_v62, %v183_v61 }
  0xf1   :  { %v463_v30 = vadd.f32 %v563_v54, %v462_v16 }
  0xf2   :  { %432 = vmatmul.f32.gmra.mxu3 %v355_v1 }
  0xf3   :  { %v465_v17 = vsel %vm464_vm0, %v563_v54, %v463_v30 }
 0x16b   :  { %v407_v2 = vpop.f32.mrf.mxu2 }
 0x16c   :  { %v430_v3 = vpop.f32.mrf.mxu3 }
 0x16d   :  { %v431_v4 = vadd.f32 %v430_v3, %v407_v2 }
 0x16f   :  { %v449_v15 = vadd.f32 %v551_v7, %v431_v4 }
 0x171   :  { %v453_v5 = vadd.f32 %v449_v15, %v764_v32 }
 0x173   :  { %455 = vadd.xlane.f32.xlu0 %v453_v5  ;;  %v410_v53 = vpop.f32.mrf.mxu2 }
 0x175   :  { %v433_v6 = vpop.f32.mrf.mxu3 }
 0x176   :  { %v434_v9 = vadd.f32 %v433_v6, %v410_v53 }
 0x178   :  { %v450_v10 = vadd.f32 %v551_v7, %v434_v9 }
 0x17a   :  { %v454_v8 = vadd.f32 %v450_v10, %v768_v33 }
 0x17c   :  { %457 = vadd.xlane.f32.xlu0 %v454_v8 }
 0x1e6   :  { %v456_v18 = vpop.xlane.xlu0 %455 }
 0x1e7   :  { %v466_v19 = vmul.f32 %v465_v17, %v456_v18 }
 0x1e9   :  { %v468_v32 = vsub.f32 %v453_v5, %v466_v19 }
 0x1eb   :  { %v470_v20 = vmul.f32 %v468_v32, %v468_v32 }
 0x1ed   :  { %472 = vadd.xlane.f32.xlu1 %v470_v20 }
 0x1ef   :  { %v458_v21 = vpop.xlane.xlu0 %457 }
 0x1f0   :  { %v467_v22 = vmul.f32 %v465_v17, %v458_v21 }
 0x1f2   :  { %v469_v23 = vsub.f32 %v454_v8, %v467_v22 }
 0x1f4   :  { %v471_v24 = vmul.f32 %v469_v23, %v469_v23 }
 0x1f6   :  { %474 = vadd.xlane.f32.xlu1 %v471_v24 }
 0x260   :  { %v473_v33 = vpop.xlane.xlu1 %472 }
 0x261   :  { %v476_v25 = vmul.f32 %v473_v33, %v465_v17 }
 0x263   :  { %v478_v26 = vadd.f32 1e-12, %v476_v25 }
 0x265   :  { %564 = vrsqrt.f32 %v478_v26  ;;  %vm486_vm2 = vweird.f32 %v478_v26 }
 0x269   :  { %v475_v29 = vpop.xlane.xlu1 %474 }
 0x26a   :  { %v477_v34 = vmul.f32 %v475_v29, %v465_v17 }
 0x26b   :  { %v565_v27 = vpop.eup %564 }
 0x26c   :  { %v481_v28 = vmul.f32 %v565_v27, %v478_v26  ;;  %v479_v36 = vadd.f32 1e-12, %v477_v34  ;;  %vm487_vm1 = vweird.f32 %v565_v27 }
 0x26d   :  { %vm488_vm3 = vmor %vm486_vm2, %vm487_vm1 }
 0x26e   :  { %v482_v35 = vmul.f32 %v565_v27, %v481_v28  ;;  %566 = vrsqrt.f32 %v479_v36  ;;  %vm496_vm5 = vweird.f32 %v479_v36 }
 0x270   :  { %v483_v37 = vmul.f32 0.5, %v482_v35 }
 0x272   :  { %v484_v38 = vsub.f32 1.5, %v483_v37 }
 0x274   :  { %v485_v39 = vmul.f32 %v565_v27, %v484_v38  ;;  %v567_v49 = vpop.eup %566 }
 0x275   :  { %v491_v45 = vmul.f32 %v567_v49, %v479_v36  ;;  %vm497_vm4 = vweird.f32 %v567_v49 }
 0x276   :  { %v489_v41 = vsel %vm488_vm3, %v565_v27, %v485_v39  ;;  %vm498_vm6 = vmor %vm496_vm5, %vm497_vm4 }
 0x277   :  { %v500_v42 = vmul.f32 %v489_v41, %v468_v32  ;;  %v492_v46 = vmul.f32 %v567_v49, %v491_v45 }
 0x279   :  { %v506_v31 = vmul.f32 %v552_v40, %v500_v42  ;;  %v493_v47 = vmul.f32 0.5, %v492_v46 }
 0x27b   :  { %v512_v44 = vadd.f32 %v553_v43, %v506_v31  ;;  %v494_v63 = vsub.f32 1.5, %v493_v47 }
 0x27d   :  { %514 = vst [vmem:[#allocation11] sm:$0xff] %v512_v44  ;;  %v495_v48 = vmul.f32 %v567_v49, %v494_v63 }
 0x27f   :  { %v499_v0 = vsel %vm498_vm6, %v567_v49, %v495_v48 }
 0x280   :  { %v501_v14 = vmul.f32 %v499_v0, %v469_v23 }
 0x282   :  { %v507_v50 = vmul.f32 %v552_v40, %v501_v14 }
 0x284   :  { %v513_v51 = vadd.f32 %v553_v43, %v507_v50 }
 0x286   :  { %515 = vst [vmem:[#allocation11 + $0x8] sm:$0xff] %v513_v51 }
 0x287   :  { %528 = dma.vmem_to_hbm [thread:$0]  %s521_s26, 256, %s523_s29, [#allocation5], %s700_s13, %s700_s13, %s701_s14  }
 0x288   :  { %694 = dma.done.wait [#allocation5], 256  }
 0x289   :  { %695 = vsyncadd [#allocation5], 4294967040 }
 0x28a   :  { %533 = vsyncpa [#allocation4], 1 }
 0x28b   :  { %534 = vsyncpa [#allocation7], 1 }
 0x28c   :  { %535 = vsyncpa [#allocation10], 1 }
 0x28d   :  { %536 = vsyncpa [#allocation5], 1 }

</bundles_post_ra>
